<compile_context>
chip_gen: v5e
topology: v5e:2x2
jax: 0.10.0
libtpu: 0.0.40
codegen_flags: <defaults>
</compile_context>

<pallas_src>
import math

import jax
import jax.numpy as jnp
from jax.experimental import pallas as pl
from jax.experimental.pallas import tpu as pltpu

_SUBLANE = 8
_LANE = 128
_MAX_TB = 2048      # cap on the batch tile (bounds per-op slab temporaries / MXU M loop)
_MAX_UNROLL = 64    # cap on the per-step column unroll (compile time / code size)


def _round_up(x, m):
    return (x + m - 1) // m * m


def _cdiv(a, b):
    return -(-a // b)


def _vmem_capacity_bytes():
    """Generation-aware physical VMEM (v5e/v6e report 128 MiB, v7x 64 MiB per TC)."""
    cap = 64 * 1024 * 1024                      # safe default for all current generations
    try:
        info_cap = int(pltpu.get_tpu_info().vmem_capacity_bytes)
        if info_cap > 0:
            cap = info_cap
    except Exception:
        pass
    return max(32 * 1024 * 1024, min(cap, 128 * 1024 * 1024))


def _default_block_i(D, w_itemsize, target_chunk_bytes=4 << 20):
    """Column-chunk size TI (TI | D): streamed weight chunk is (D, TI*D).
    Big enough for DMA efficiency / MXU N-dim, small enough to double-buffer."""
    legal = [ti for ti in range(1, D + 1)
             if D % ti == 0 and ((ti * D) % _LANE == 0 or ti == D)]
    fitting = [ti for ti in legal
               if ti <= _MAX_UNROLL and D * ti * D * w_itemsize <= target_chunk_bytes]
    return max(fitting) if fitting else min(legal)


def prepare_weight(weight, *, block_i=None, weight_dtype=None):
    """Hoistable (parameter-static) weight relayout.

    Returns
      w_x: (NT, D, TI*D) with w_x[t, k, r*D + i] = weight[k, i*D + (t*TI + r)]
      w_b: (NT, 1, TI*D) the matching columns of the bias (ones) row, kept f32.
    The inner (D, D) matrix is transposed so the in-kernel matmul yields M^T
    (columns of M lane-dense), chunked over j on a leading axis.
    """
    Dp1, D2 = weight.shape
    D = Dp1 - 1
    assert D * D == D2, "weight must have shape (D+1, D*D)"
    w_dtype = jnp.dtype(weight_dtype) if weight_dtype is not None else jnp.dtype(weight.dtype)
    ti = block_i if block_i is not None else _default_block_i(D, w_dtype.itemsize)
    assert D % ti == 0, "block_i must divide D"
    nt = D // ti
    wt = jnp.swapaxes(weight.reshape(Dp1, D, D), 1, 2).reshape(Dp1, D * D)   # [k, j*D + i]
    w_x = wt[:D].reshape(D, nt, ti * D).transpose(1, 0, 2)                   # (NT, D, TI*D)
    w_b = wt[D:].reshape(1, nt, ti * D).transpose(1, 0, 2)                   # (NT, 1, TI*D)
    return w_x.astype(w_dtype), w_b.astype(jnp.float32)


def _choose_tiling(B, D, ti, x_bytes, w_bytes, o_bytes, tiling_budget):
    nt = D // ti
    Wc = ti * D
    B8 = _round_up(max(B, 1), _SUBLANE)
    usable = int(tiling_budget * 0.9)

    per_row = (Wc * 4             # M^T chunk scratch (f32)
               + D * 4            # output accumulator (f32)
               + 2 * D * x_bytes  # x tile, double-buffered
               + 2 * D * 4        # grad_H tile (f32), double-buffered
               + 2 * D * o_bytes  # output tile, double-buffered
               + 4 * D * 4)       # headroom for elementwise temporaries

    fixed_stream = 2 * D * Wc * w_bytes + 2 * _SUBLANE * Wc * 4
    fixed_res = 2 * nt * D * Wc * w_bytes + 2 * nt * _SUBLANE * Wc * 4

    def tb_for(fixed):
        avail = usable - fixed
        if avail <= 0:
            return 0
        return int(min(avail // per_row, B8, _MAX_TB)) // _SUBLANE * _SUBLANE

    cands = []
    for resident, fixed in ((False, fixed_stream), (True, fixed_res)):
        tb = tb_for(fixed)
        if tb < _SUBLANE:
            continue
        nb = _cdiv(B8, tb)
        traffic = (1 if resident else nb) * (D + 1) * D * D * w_bytes
        # Prefer: least weight HBM traffic, then fewest grid steps, then streamed (less VMEM).
        cands.append(((traffic, nb * nt, 1 if resident else 0), tb, nb, resident))
    if not cands:
        return _SUBLANE, _cdiv(B8, _SUBLANE), False    # rely on vmem_limit headroom
    cands.sort(key=lambda c: c[0])
    _, tb, nb, resident = cands[0]

    # Megacore: v7x shards the "parallel" batch axis over 2 TensorCores; avoid NB == 1 when
    # the extra weight re-stream is free (resident) or amortized (very large batch).
    if nb == 1 and B8 >= 2 * _SUBLANE and (resident or B8 >= 4096):
        tb = _round_up(_cdiv(B8, 2), _SUBLANE)
        nb = _cdiv(B8, tb)
    return tb, nb, resident


def _make_kernel(D, TI, NT, inv_sqrt_d, weight_resident):
    def kernel(x_ref, gh_ref, w_ref, b_ref, o_ref, mt_ref, acc_ref):
        t = pl.program_id(1)

        @pl.when(t == 0)
        def _init():
            acc_ref[...] = jnp.zeros_like(acc_ref)

        widx = t if weight_resident else 0

        # Stage 1: one lane-dense MXU matmul gives TI columns of M (rows of M^T) for every
        # sample of the batch tile:  mt[:, r*D:(r+1)*D] == M[:, :, j]  with  j = t*TI + r.
        mt_ref[...] = (
            jnp.dot(x_ref[...], w_ref[widx], preferred_element_type=jnp.float32)
            + b_ref[widx].astype(jnp.float32)
        )

        # Stage 2 (every grid step, overlapped with the next chunk's weight DMA):
        #   v_j  = <grad_H, M[:, :, j]>   one cross-lane reduce -> (TB, 1)
        #   acc += v_j * M[:, :, j]       lane-dense broadcast-FMA
        # R = M @ M^T / sqrt(D) is never materialized and there is no serial tail.
        for r in range(TI):
            col = mt_ref[:, r * D:(r + 1) * D]
            vj = jnp.sum(gh_ref[...] * col, axis=-1, keepdims=True)
            acc_ref[...] += vj * col

        @pl.when(t == NT - 1)
        def _finish():
            o_ref[...] = (acc_ref[...] * inv_sqrt_d).astype(o_ref.dtype)

    return kernel


def rquadratic_apply(x, grad_H, w_x, w_b, *, use_bf16=False, block_b=None):
    """out[b] = grad_H[b] @ (M_b @ M_b^T) / sqrt(D), M_b = reshape([x_b, 1] @ weight, (D, D)).

    w_x, w_b come from prepare_weight (parameter-static relayout, hoist it out of the step)."""
    B, D = x.shape
    assert grad_H.shape == (B, D)
    NT, Dw, Wc = w_x.shape
    TI = Wc // D
    assert Dw == D and TI * D == Wc and NT * TI == D, "w_x does not match D; use prepare_weight"
    assert w_b.shape == (NT, 1, Wc)

    out_dtype = x.dtype
    if use_bf16:
        x = x.astype(jnp.bfloat16)
    grad_H = grad_H.astype(jnp.float32)

    x_bytes = jnp.dtype(x.dtype).itemsize
    w_bytes = jnp.dtype(w_x.dtype).itemsize
    o_bytes = jnp.dtype(out_dtype).itemsize

    cap = _vmem_capacity_bytes()
    tiling_budget = int(cap * 0.78)
    vmem_limit = min(int(cap * 0.9), 100 * 1024 * 1024)

    if block_b is not None:
        TB = _round_up(block_b, _SUBLANE)
        NB = _cdiv(_round_up(B, _SUBLANE), TB)
        resident = False
    else:
        TB, NB, resident = _choose_tiling(B, D, TI, x_bytes, w_bytes, o_bytes, tiling_budget)

    B_pad = NB * TB
    if B_pad != B:
        pad = ((0, B_pad - B), (0, 0))
        x = jnp.pad(x, pad)
        grad_H = jnp.pad(grad_H, pad)

    if resident:
        # Whole weight DMA'd once and kept VMEM-resident across all batch tiles.
        w_spec = pl.BlockSpec((NT, D, Wc), lambda b, t: (0, 0, 0))
        b_spec = pl.BlockSpec((NT, 1, Wc), lambda b, t: (0, 0, 0))
    else:
        # Weight streamed chunk-by-chunk by the BlockSpec pipeline.
        w_spec = pl.BlockSpec((1, D, Wc), lambda b, t: (t, 0, 0))
        b_spec = pl.BlockSpec((1, 1, Wc), lambda b, t: (t, 0, 0))

    kernel = _make_kernel(D, TI, NT, 1.0 / math.sqrt(D), resident)

    flops = 2 * B_pad * D * D * D + 4 * B_pad * D * D
    bytes_accessed = ((1 if resident else NB) * (D + 1) * D * D * w_bytes
                      + B_pad * D * (x_bytes + 4 + o_bytes))

    out = pl.pallas_call(
        kernel,
        out_shape=jax.ShapeDtypeStruct((B_pad, D), out_dtype),
        grid=(NB, NT),
        in_specs=[
            pl.BlockSpec((TB, D), lambda b, t: (b, 0)),   # x tile (resident across t)
            pl.BlockSpec((TB, D), lambda b, t: (b, 0)),   # grad_H tile (resident across t)
            w_spec,
            b_spec,
        ],
        out_specs=pl.BlockSpec((TB, D), lambda b, t: (b, 0)),
        scratch_shapes=[
            pltpu.VMEM((TB, Wc), jnp.float32),   # current M^T chunk
            pltpu.VMEM((TB, D), jnp.float32),    # output accumulator
        ],
        compiler_params=pltpu.CompilerParams(
            dimension_semantics=("parallel", "arbitrary"),
            vmem_limit_bytes=vmem_limit,
        ),
        cost_estimate=pl.CostEstimate(
            flops=int(flops), transcendentals=0, bytes_accessed=int(bytes_accessed)),
    )(x, grad_H, w_x, w_b)

    return out[:B] if B_pad != B else out


def rquadratic_forward(x, grad_H, weight, *, use_bf16=False, block_b=None, block_i=None):
    """Convenience wrapper mirroring RQuadratic.forward (weight relayout not hoisted)."""
    w_dtype = jnp.bfloat16 if use_bf16 else None
    w_x, w_b = prepare_weight(weight, block_i=block_i, weight_dtype=w_dtype)
    return rquadratic_apply(x, grad_H, w_x, w_b, use_bf16=use_bf16, block_b=block_b)


def rquadratic_ref(x, grad_H, weight):
    """Pure-JAX reference mirroring the PyTorch forward."""
    B, D = x.shape
    xa = jnp.concatenate([x, jnp.ones((B, 1), x.dtype)], axis=1)
    M = (xa @ weight).reshape(B, D, D)
    R = jnp.einsum('bij,bkj->bik', M, M) / math.sqrt(D)
    return jnp.einsum('bi,bik->bk', grad_H, R)


if __name__ == "__main__":
    B, D = 16, 8
    key = jax.random.PRNGKey(0)
    kx, kg, kw = jax.random.split(key, 3)
    x = jax.random.normal(kx, (B, D), dtype=jnp.float32)
    grad_H = jax.random.normal(kg, (B, D), dtype=jnp.float32)
    # kaiming_normal_ (fan_in = D^2, gain = sqrt(2)) -> std = sqrt(2 / D^2), deterministic here.
    weight = jax.random.normal(kw, (D + 1, D * D), dtype=jnp.float32) * math.sqrt(2.0 / (D * D))

    ref = rquadratic_ref(x, grad_H, weight)

    # Parameter-static weight relayout, hoisted out of the forward.
    w_x, w_b = prepare_weight(weight)

    out = rquadratic_apply(x, grad_H, w_x, w_b)
    jax.block_until_ready(out)
    assert out.shape == (B, D) and out.dtype == jnp.float32
    assert jnp.allclose(out, ref, atol=1e-4, rtol=1e-3), float(jnp.max(jnp.abs(out - ref)))

    # Ragged batch (exercises host-side padding to the batch tile).
    out13 = rquadratic_apply(x[:13], grad_H[:13], w_x, w_b)
    jax.block_until_ready(out13)
    assert jnp.allclose(out13, ref[:13], atol=1e-4, rtol=1e-3)

    # bf16 weight/x streaming (MXU-native on v6e/v7x, halves weight DMA on v5e), f32 accumulation.
    w_x16, w_b16 = prepare_weight(weight, weight_dtype=jnp.bfloat16)
    out16 = rquadratic_apply(x, grad_H, w_x16, w_b16, use_bf16=True)
    jax.block_until_ready(out16)
    assert out16.dtype == jnp.float32
    assert jnp.allclose(out16, ref, atol=1e-1, rtol=5e-2)

    print("KERNEL_OK")
</pallas_src>

<mosaic_0001>
module attributes {stable_mosaic.version = 11 : i64} {
  func.func @kernel(%arg0: i32, %arg1: i32, %arg2: memref<16x8xf32, #tpu.memory_space<vmem>>, %arg3: memref<16x8xf32, #tpu.memory_space<vmem>>, %arg4: memref<1x8x64xf32, #tpu.memory_space<vmem>>, %arg5: memref<1x1x64xf32, #tpu.memory_space<vmem>>, %arg6: memref<16x8xf32, #tpu.memory_space<vmem>>, %arg7: memref<16x64xf32, #tpu.memory_space<vmem>>, %arg8: memref<16x8xf32, #tpu.memory_space<vmem>>) attributes {dimension_semantics = [#tpu.dimension_semantics<parallel>, #tpu.dimension_semantics<arbitrary>], iteration_bounds = array<i64: 1, 1>, scalar_prefetch = 0 : i64, scratch_operands = 2 : i64, tpu.core_type = #tpu.core_type<tc>, window_params = [{transform_indices = @transform_0, window_bounds = array<i64: 16, 8>}, {transform_indices = @transform_1, window_bounds = array<i64: 16, 8>}, {transform_indices = @transform_2, window_bounds = array<i64: 1, 8, 64>}, {transform_indices = @transform_3, window_bounds = array<i64: 1, 1, 64>}, {transform_indices = @transform_4, window_bounds = array<i64: 16, 8>}]} {
    %c0_i32 = arith.constant 0 : i32
    %0 = arith.cmpi eq, %arg1, %c0_i32 : i32
    %1 = arith.extui %0 : i1 to i32
    %c0_i32_0 = arith.constant 0 : i32
    %2 = arith.cmpi ne, %1, %c0_i32_0 : i32
    scf.if %2 {
      %cst_77 = arith.constant 0.000000e+00 : f32
      %95 = vector.broadcast %cst_77 : f32 to vector<16x8xf32>
      %c0_78 = arith.constant 0 : index
      %c0_79 = arith.constant 0 : index
      %96 = vector.load %arg8[%c0_78, %c0_79] : memref<16x8xf32, #tpu.memory_space<vmem>>, vector<16x8xf32>
      tpu.vector_store %arg8[%c0_78, %c0_79], %95 {strides = array<i32>} : memref<16x8xf32, #tpu.memory_space<vmem>>, vector<16x8xf32>,
    } else {
    }
    %c0 = arith.constant 0 : index
    %c0_1 = arith.constant 0 : index
    %3 = vector.load %arg2[%c0, %c0_1] : memref<16x8xf32, #tpu.memory_space<vmem>>, vector<16x8xf32>
    %c0_2 = arith.constant 0 : index
    %c0_3 = arith.constant 0 : index
    %c0_4 = arith.constant 0 : index
    %4 = vector.load %arg4[%c0_2, %c0_3, %c0_4] : memref<1x8x64xf32, #tpu.memory_space<vmem>>, vector<1x8x64xf32>
    %5 = vector.shape_cast %4 : vector<1x8x64xf32> to vector<8x64xf32>
    %cst = arith.constant dense<0.000000e+00> : vector<16x64xf32>
    %6 = tpu.matmul %3, %5, %cst {dimension_numbers = #tpu.dot_dimension_numbers<[1], [0], [0], [1], [0, 0, 1, 1], [], []>} : vector<16x8xf32>, vector<8x64xf32>, vector<16x64xf32> -> vector<16x64xf32>
    %c0_5 = arith.constant 0 : index
    %c0_6 = arith.constant 0 : index
    %c0_7 = arith.constant 0 : index
    %7 = vector.load %arg5[%c0_5, %c0_6, %c0_7] : memref<1x1x64xf32, #tpu.memory_space<vmem>>, vector<1x1x64xf32>
    %8 = vector.shape_cast %7 : vector<1x1x64xf32> to vector<1x64xf32>
    %9 = vector.broadcast %8 : vector<1x64xf32> to vector<16x64xf32>
    %10 = arith.addf %6, %9 : vector<16x64xf32>
    %c0_8 = arith.constant 0 : index
    %c0_9 = arith.constant 0 : index
    %11 = vector.load %arg7[%c0_8, %c0_9] : memref<16x64xf32, #tpu.memory_space<vmem>>, vector<16x64xf32>
    tpu.vector_store %arg7[%c0_8, %c0_9], %10 {strides = array<i32>} : memref<16x64xf32, #tpu.memory_space<vmem>>, vector<16x64xf32>,
    %c0_10 = arith.constant 0 : index
    %c0_11 = arith.constant 0 : index
    %12 = vector.load %arg7[%c0_10, %c0_11] : memref<16x64xf32, #tpu.memory_space<vmem>>, vector<16x8xf32>
    %c0_12 = arith.constant 0 : index
    %c0_13 = arith.constant 0 : index
    %13 = vector.load %arg3[%c0_12, %c0_13] : memref<16x8xf32, #tpu.memory_space<vmem>>, vector<16x8xf32>
    %14 = arith.mulf %13, %12 : vector<16x8xf32>
    %cst_14 = arith.constant dense<0.000000e+00> : vector<16xf32>
    %15 = vector.multi_reduction <add>, %14, %cst_14 [1] : vector<16x8xf32> to vector<16xf32>
    %16 = vector.shape_cast %15 : vector<16xf32> to vector<16x1xf32>
    %c0_15 = arith.constant 0 : index
    %c0_16 = arith.constant 0 : index
    %17 = vector.load %arg8[%c0_15, %c0_16] : memref<16x8xf32, #tpu.memory_space<vmem>>, vector<16x8xf32>
    %18 = vector.broadcast %16 : vector<16x1xf32> to vector<16x8xf32>
    %19 = arith.mulf %18, %12 : vector<16x8xf32>
    %20 = arith.addf %17, %19 : vector<16x8xf32>
    %c0_17 = arith.constant 0 : index
    %c0_18 = arith.constant 0 : index
    %21 = vector.load %arg8[%c0_17, %c0_18] : memref<16x8xf32, #tpu.memory_space<vmem>>, vector<16x8xf32>
    tpu.vector_store %arg8[%c0_17, %c0_18], %20 {strides = array<i32>} : memref<16x8xf32, #tpu.memory_space<vmem>>, vector<16x8xf32>,
    %c0_19 = arith.constant 0 : index
    %c8 = arith.constant 8 : index
    %22 = vector.load %arg7[%c0_19, %c8] : memref<16x64xf32, #tpu.memory_space<vmem>>, vector<16x8xf32>
    %c0_20 = arith.constant 0 : index
    %c0_21 = arith.constant 0 : index
    %23 = vector.load %arg3[%c0_20, %c0_21] : memref<16x8xf32, #tpu.memory_space<vmem>>, vector<16x8xf32>
    %24 = arith.mulf %23, %22 : vector<16x8xf32>
    %cst_22 = arith.constant dense<0.000000e+00> : vector<16xf32>
    %25 = vector.multi_reduction <add>, %24, %cst_22 [1] : vector<16x8xf32> to vector<16xf32>
    %26 = vector.shape_cast %25 : vector<16xf32> to vector<16x1xf32>
    %c0_23 = arith.constant 0 : index
    %c0_24 = arith.constant 0 : index
    %27 = vector.load %arg8[%c0_23, %c0_24] : memref<16x8xf32, #tpu.memory_space<vmem>>, vector<16x8xf32>
    %28 = vector.broadcast %26 : vector<16x1xf32> to vector<16x8xf32>
    %29 = arith.mulf %28, %22 : vector<16x8xf32>
    %30 = arith.addf %27, %29 : vector<16x8xf32>
    %c0_25 = arith.constant 0 : index
    %c0_26 = arith.constant 0 : index
    %31 = vector.load %arg8[%c0_25, %c0_26] : memref<16x8xf32, #tpu.memory_space<vmem>>, vector<16x8xf32>
    tpu.vector_store %arg8[%c0_25, %c0_26], %30 {strides = array<i32>} : memref<16x8xf32, #tpu.memory_space<vmem>>, vector<16x8xf32>,
    %c0_27 = arith.constant 0 : index
    %c16 = arith.constant 16 : index
    %32 = vector.load %arg7[%c0_27, %c16] : memref<16x64xf32, #tpu.memory_space<vmem>>, vector<16x8xf32>
    %c0_28 = arith.constant 0 : index
    %c0_29 = arith.constant 0 : index
    %33 = vector.load %arg3[%c0_28, %c0_29] : memref<16x8xf32, #tpu.memory_space<vmem>>, vector<16x8xf32>
    %34 = arith.mulf %33, %32 : vector<16x8xf32>
    %cst_30 = arith.constant dense<0.000000e+00> : vector<16xf32>
    %35 = vector.multi_reduction <add>, %34, %cst_30 [1] : vector<16x8xf32> to vector<16xf32>
    %36 = vector.shape_cast %35 : vector<16xf32> to vector<16x1xf32>
    %c0_31 = arith.constant 0 : index
    %c0_32 = arith.constant 0 : index
    %37 = vector.load %arg8[%c0_31, %c0_32] : memref<16x8xf32, #tpu.memory_space<vmem>>, vector<16x8xf32>
    %38 = vector.broadcast %36 : vector<16x1xf32> to vector<16x8xf32>
    %39 = arith.mulf %38, %32 : vector<16x8xf32>
    %40 = arith.addf %37, %39 : vector<16x8xf32>
    %c0_33 = arith.constant 0 : index
    %c0_34 = arith.constant 0 : index
    %41 = vector.load %arg8[%c0_33, %c0_34] : memref<16x8xf32, #tpu.memory_space<vmem>>, vector<16x8xf32>
    tpu.vector_store %arg8[%c0_33, %c0_34], %40 {strides = array<i32>} : memref<16x8xf32, #tpu.memory_space<vmem>>, vector<16x8xf32>,
    %c0_35 = arith.constant 0 : index
    %c24 = arith.constant 24 : index
    %42 = vector.load %arg7[%c0_35, %c24] : memref<16x64xf32, #tpu.memory_space<vmem>>, vector<16x8xf32>
    %c0_36 = arith.constant 0 : index
    %c0_37 = arith.constant 0 : index
    %43 = vector.load %arg3[%c0_36, %c0_37] : memref<16x8xf32, #tpu.memory_space<vmem>>, vector<16x8xf32>
    %44 = arith.mulf %43, %42 : vector<16x8xf32>
    %cst_38 = arith.constant dense<0.000000e+00> : vector<16xf32>
    %45 = vector.multi_reduction <add>, %44, %cst_38 [1] : vector<16x8xf32> to vector<16xf32>
    %46 = vector.shape_cast %45 : vector<16xf32> to vector<16x1xf32>
    %c0_39 = arith.constant 0 : index
    %c0_40 = arith.constant 0 : index
    %47 = vector.load %arg8[%c0_39, %c0_40] : memref<16x8xf32, #tpu.memory_space<vmem>>, vector<16x8xf32>
    %48 = vector.broadcast %46 : vector<16x1xf32> to vector<16x8xf32>
    %49 = arith.mulf %48, %42 : vector<16x8xf32>
    %50 = arith.addf %47, %49 : vector<16x8xf32>
    %c0_41 = arith.constant 0 : index
    %c0_42 = arith.constant 0 : index
    %51 = vector.load %arg8[%c0_41, %c0_42] : memref<16x8xf32, #tpu.memory_space<vmem>>, vector<16x8xf32>
    tpu.vector_store %arg8[%c0_41, %c0_42], %50 {strides = array<i32>} : memref<16x8xf32, #tpu.memory_space<vmem>>, vector<16x8xf32>,
    %c0_43 = arith.constant 0 : index
    %c32 = arith.constant 32 : index
    %52 = vector.load %arg7[%c0_43, %c32] : memref<16x64xf32, #tpu.memory_space<vmem>>, vector<16x8xf32>
    %c0_44 = arith.constant 0 : index
    %c0_45 = arith.constant 0 : index
    %53 = vector.load %arg3[%c0_44, %c0_45] : memref<16x8xf32, #tpu.memory_space<vmem>>, vector<16x8xf32>
    %54 = arith.mulf %53, %52 : vector<16x8xf32>
    %cst_46 = arith.constant dense<0.000000e+00> : vector<16xf32>
    %55 = vector.multi_reduction <add>, %54, %cst_46 [1] : vector<16x8xf32> to vector<16xf32>
    %56 = vector.shape_cast %55 : vector<16xf32> to vector<16x1xf32>
    %c0_47 = arith.constant 0 : index
    %c0_48 = arith.constant 0 : index
    %57 = vector.load %arg8[%c0_47, %c0_48] : memref<16x8xf32, #tpu.memory_space<vmem>>, vector<16x8xf32>
    %58 = vector.broadcast %56 : vector<16x1xf32> to vector<16x8xf32>
    %59 = arith.mulf %58, %52 : vector<16x8xf32>
    %60 = arith.addf %57, %59 : vector<16x8xf32>
    %c0_49 = arith.constant 0 : index
    %c0_50 = arith.constant 0 : index
    %61 = vector.load %arg8[%c0_49, %c0_50] : memref<16x8xf32, #tpu.memory_space<vmem>>, vector<16x8xf32>
    tpu.vector_store %arg8[%c0_49, %c0_50], %60 {strides = array<i32>} : memref<16x8xf32, #tpu.memory_space<vmem>>, vector<16x8xf32>,
    %c0_51 = arith.constant 0 : index
    %c40 = arith.constant 40 : index
    %62 = vector.load %arg7[%c0_51, %c40] : memref<16x64xf32, #tpu.memory_space<vmem>>, vector<16x8xf32>
    %c0_52 = arith.constant 0 : index
    %c0_53 = arith.constant 0 : index
    %63 = vector.load %arg3[%c0_52, %c0_53] : memref<16x8xf32, #tpu.memory_space<vmem>>, vector<16x8xf32>
    %64 = arith.mulf %63, %62 : vector<16x8xf32>
    %cst_54 = arith.constant dense<0.000000e+00> : vector<16xf32>
    %65 = vector.multi_reduction <add>, %64, %cst_54 [1] : vector<16x8xf32> to vector<16xf32>
    %66 = vector.shape_cast %65 : vector<16xf32> to vector<16x1xf32>
    %c0_55 = arith.constant 0 : index
    %c0_56 = arith.constant 0 : index
    %67 = vector.load %arg8[%c0_55, %c0_56] : memref<16x8xf32, #tpu.memory_space<vmem>>, vector<16x8xf32>
    %68 = vector.broadcast %66 : vector<16x1xf32> to vector<16x8xf32>
    %69 = arith.mulf %68, %62 : vector<16x8xf32>
    %70 = arith.addf %67, %69 : vector<16x8xf32>
    %c0_57 = arith.constant 0 : index
    %c0_58 = arith.constant 0 : index
    %71 = vector.load %arg8[%c0_57, %c0_58] : memref<16x8xf32, #tpu.memory_space<vmem>>, vector<16x8xf32>
    tpu.vector_store %arg8[%c0_57, %c0_58], %70 {strides = array<i32>} : memref<16x8xf32, #tpu.memory_space<vmem>>, vector<16x8xf32>,
    %c0_59 = arith.constant 0 : index
    %c48 = arith.constant 48 : index
    %72 = vector.load %arg7[%c0_59, %c48] : memref<16x64xf32, #tpu.memory_space<vmem>>, vector<16x8xf32>
    %c0_60 = arith.constant 0 : index
    %c0_61 = arith.constant 0 : index
    %73 = vector.load %arg3[%c0_60, %c0_61] : memref<16x8xf32, #tpu.memory_space<vmem>>, vector<16x8xf32>
    %74 = arith.mulf %73, %72 : vector<16x8xf32>
    %cst_62 = arith.constant dense<0.000000e+00> : vector<16xf32>
    %75 = vector.multi_reduction <add>, %74, %cst_62 [1] : vector<16x8xf32> to vector<16xf32>
    %76 = vector.shape_cast %75 : vector<16xf32> to vector<16x1xf32>
    %c0_63 = arith.constant 0 : index
    %c0_64 = arith.constant 0 : index
    %77 = vector.load %arg8[%c0_63, %c0_64] : memref<16x8xf32, #tpu.memory_space<vmem>>, vector<16x8xf32>
    %78 = vector.broadcast %76 : vector<16x1xf32> to vector<16x8xf32>
    %79 = arith.mulf %78, %72 : vector<16x8xf32>
    %80 = arith.addf %77, %79 : vector<16x8xf32>
    %c0_65 = arith.constant 0 : index
    %c0_66 = arith.constant 0 : index
    %81 = vector.load %arg8[%c0_65, %c0_66] : memref<16x8xf32, #tpu.memory_space<vmem>>, vector<16x8xf32>
    tpu.vector_store %arg8[%c0_65, %c0_66], %80 {strides = array<i32>} : memref<16x8xf32, #tpu.memory_space<vmem>>, vector<16x8xf32>,
    %c0_67 = arith.constant 0 : index
    %c56 = arith.constant 56 : index
    %82 = vector.load %arg7[%c0_67, %c56] : memref<16x64xf32, #tpu.memory_space<vmem>>, vector<16x8xf32>
    %c0_68 = arith.constant 0 : index
    %c0_69 = arith.constant 0 : index
    %83 = vector.load %arg3[%c0_68, %c0_69] : memref<16x8xf32, #tpu.memory_space<vmem>>, vector<16x8xf32>
    %84 = arith.mulf %83, %82 : vector<16x8xf32>
    %cst_70 = arith.constant dense<0.000000e+00> : vector<16xf32>
    %85 = vector.multi_reduction <add>, %84, %cst_70 [1] : vector<16x8xf32> to vector<16xf32>
    %86 = vector.shape_cast %85 : vector<16xf32> to vector<16x1xf32>
    %c0_71 = arith.constant 0 : index
    %c0_72 = arith.constant 0 : index
    %87 = vector.load %arg8[%c0_71, %c0_72] : memref<16x8xf32, #tpu.memory_space<vmem>>, vector<16x8xf32>
    %88 = vector.broadcast %86 : vector<16x1xf32> to vector<16x8xf32>
    %89 = arith.mulf %88, %82 : vector<16x8xf32>
    %90 = arith.addf %87, %89 : vector<16x8xf32>
    %c0_73 = arith.constant 0 : index
    %c0_74 = arith.constant 0 : index
    %91 = vector.load %arg8[%c0_73, %c0_74] : memref<16x8xf32, #tpu.memory_space<vmem>>, vector<16x8xf32>
    tpu.vector_store %arg8[%c0_73, %c0_74], %90 {strides = array<i32>} : memref<16x8xf32, #tpu.memory_space<vmem>>, vector<16x8xf32>,
    %c0_i32_75 = arith.constant 0 : i32
    %92 = arith.cmpi eq, %arg1, %c0_i32_75 : i32
    %93 = arith.extui %92 : i1 to i32
    %c0_i32_76 = arith.constant 0 : i32
    %94 = arith.cmpi ne, %93, %c0_i32_76 : i32
    scf.if %94 {
      %c0_77 = arith.constant 0 : index
      %c0_78 = arith.constant 0 : index
      %95 = vector.load %arg8[%c0_77, %c0_78] : memref<16x8xf32, #tpu.memory_space<vmem>>, vector<16x8xf32>
      %cst_79 = arith.constant 0.353553385 : f32
      %96 = vector.broadcast %cst_79 : f32 to vector<16x8xf32>
      %97 = arith.mulf %95, %96 : vector<16x8xf32>
      %c0_80 = arith.constant 0 : index
      %c0_81 = arith.constant 0 : index
      %98 = vector.load %arg6[%c0_80, %c0_81] : memref<16x8xf32, #tpu.memory_space<vmem>>, vector<16x8xf32>
      tpu.vector_store %arg6[%c0_80, %c0_81], %97 {strides = array<i32>} : memref<16x8xf32, #tpu.memory_space<vmem>>, vector<16x8xf32>,
    } else {
    }
    return
  }
  func.func @transform_0(%arg0: i32, %arg1: i32) -> (i32, i32) {
    %c0_i32 = arith.constant 0 : i32
    %c0_i32_0 = arith.constant 0 : i32
    return %arg0, %c0_i32 : i32, i32
  }
  func.func @transform_1(%arg0: i32, %arg1: i32) -> (i32, i32) {
    %c0_i32 = arith.constant 0 : i32
    %c0_i32_0 = arith.constant 0 : i32
    return %arg0, %c0_i32 : i32, i32
  }
  func.func @transform_2(%arg0: i32, %arg1: i32) -> (i32, i32, i32) {
    %c0_i32 = arith.constant 0 : i32
    %c0_i32_0 = arith.constant 0 : i32
    %c0_i32_1 = arith.constant 0 : i32
    return %arg1, %c0_i32, %c0_i32_0 : i32, i32, i32
  }
  func.func @transform_3(%arg0: i32, %arg1: i32) -> (i32, i32, i32) {
    %c0_i32 = arith.constant 0 : i32
    %c0_i32_0 = arith.constant 0 : i32
    %c0_i32_1 = arith.constant 0 : i32
    return %arg1, %c0_i32, %c0_i32_0 : i32, i32, i32
  }
  func.func @transform_4(%arg0: i32, %arg1: i32) -> (i32, i32) {
    %c0_i32 = arith.constant 0 : i32
    %c0_i32_0 = arith.constant 0 : i32
    return %arg0, %c0_i32 : i32, i32
  }
}

</mosaic_0001>

<bundles_post_ra>
// kernel: tpu_custom_call.1
= control target key start
LH: loop header
LB: loop body
LE: loop exit
PB: predicated region body
PF: predicated region fallthrough
CT: control target
= control target key end

     0   :  { %vm21_vm0 = vcmask 64512   ;;  %vm61_vm1 = vcmask 523264   ;;  %s363_s23 = smov 120   ;;  %s365_s24 = smov 104   ;;  %v368_v36 = vmov 0.0   ;;  %s540_s2 = inlined_call_operand.vmem [shape: f32[1,8,64], index: 2, kind: input, shape index: {}]   ;;  %s541_s0 = inlined_call_operand.vmem [shape: f32[16,8], index: 0, kind: input, shape index: {}]   ;;  %s542_s3 = inlined_call_operand.vmem [shape: f32[1,1,64], index: 3, kind: input, shape index: {}]   ;;  %s543_s1 = inlined_call_operand.vmem [shape: f32[16,8], index: 1, kind: input, shape index: {}]   ;;  %s544_s4 = inlined_call_operand.vmem [shape: f32[16,8], index: 4, kind: output, shape index: {}]  }
   0x1   :  { %v26_v0 = vld [vmem:[%s540_s2] sm:$0xff]  ;;  %v25_v2 = vld [vmem:[%s541_s0 + $0x8] sm:$0xff]  ;;  %s362_s2 = smov 112   ;;  %s366_s25 = smov 72   ;;  %22 = vst.msk [vmem:[#allocation3] sm:$0xff] %vm21_vm0, %v368_v36 }
   0x2   :  { %v24_v1 = vld [vmem:[%s541_s0] sm:$0xff]  ;;  %53 = vmatpush.msra.mxu0 %v26_v0  ;;  %351 = vmatpush.msra.mxu1 %v26_v0  ;;  %s361_s0 = smov 88   ;;  %s367_s26 = smov 96   ;;  %v451_v13 = vld [vmem:[%s543_s1 + $0x8] sm:$0xff]  ;;  %23 = vst.msk [vmem:[#allocation3 + $0x8] sm:$0xff] %vm21_vm0, %v368_v36 }
   0x3   :  { %349 = vmatmul.msk.f32.vlgmr.msra.gmra.mxu0 %vm21_vm0, %v24_v1  ;;  %350 = vmatmul.msk.f32.vlgmr.msra.gmra.mxu1 %vm21_vm0, %v25_v2  ;;  %v360_v3 = vld [vmem:[%s542_s3] ss:$0 sm:$0xff]  ;;  %s364_s3 = smov 80  }
   0x4   :  { %v443_v10 = vld [vmem:[%s543_s1] sm:$0xff] }
   0x8   :  { %v76_v51 = vld [vmem:[#allocation3] sm:$0xff] }
   0x9   :  { %v77_v55 = vld [vmem:[#allocation3 + $0x8] sm:$0xff] }
  0x80   :  { %v55_v4 = vpop.f32.mrf.mxu0  ;;  %v58_v5 = vpop.f32.mrf.mxu1 }
  0x81   :  { %v56_v6 = vadd.f32 %v360_v3, %v55_v4  ;;  %v59_v7 = vadd.f32 %v360_v3, %v58_v5 }
  0x83   :  { %62 = vst.msk [vmem:[#allocation2] sm:$0xff] %vm61_vm1, %v56_v6 }
  0x84   :  { %63 = vst.msk [vmem:[#allocation2 + $0x8] sm:$0xff] %vm61_vm1, %v59_v7 }
  0x8a   :  { %v408_v8 = vld [vmem:[#allocation2] sm:$0xff] }
  0x8b   :  { %234 = vrot.lane.b32.xlu0 %v408_v8, %s361_s0  ;;  %126 = vrot.lane.b32.xlu2 %v408_v8, %s362_s2  ;;  %v416_v9 = vld [vmem:[#allocation2 + $0x8] sm:$0xff]  ;;  %v68_v11 = vmul.f32 %v408_v8, %v443_v10 }
  0x8c   :  { %90 = vrot.lane.b32.xlu1 %v408_v8, %s363_s23  ;;  %v69_v14 = vmul.f32 %v416_v9, %v451_v13 }
  0x8d   :  { %v70_v12 = vsel %vm21_vm0, %v68_v11, 0.0 }
  0x8e   :  { %v73_v15 = vsel %vm21_vm0, %v69_v14, 0.0 }
  0x93   :  { %270 = vrot.lane.b32.xlu0 %v408_v8, %s364_s3  ;;  %162 = vrot.lane.b32.xlu2 %v408_v8, %s365_s24 }
  0x94   :  { %92 = vrot.lane.b32.xlu1 %v416_v9, %s363_s23 }
  0x9b   :  { %306 = vrot.lane.b32.xlu0 %v408_v8, %s366_s25  ;;  %164 = vrot.lane.b32.xlu2 %v416_v9, %s365_s24 }
  0x9c   :  { %128 = vrot.lane.b32.xlu1 %v416_v9, %s362_s2 }
  0xa3   :  { %198 = vrot.lane.b32.xlu2 %v408_v8, %s367_s26 }
  0xa4   :  { %272 = vrot.lane.b32.xlu1 %v416_v9, %s364_s3 }
  0xab   :  { %200 = vrot.lane.b32.xlu2 %v416_v9, %s367_s26 }
  0xac   :  { %308 = vrot.lane.b32.xlu1 %v416_v9, %s366_s25 }
  0xb3   :  { %236 = vrot.lane.b32.xlu2 %v416_v9, %s361_s0 }
  0xc5   :  { %71 = vadd.xlane.f32.xlu0 %v70_v12 }
  0xcd   :  { %74 = vadd.xlane.f32.xlu0 %v73_v15 }
  0xe5   :  { %v127_v16 = vpop.permute.xlu2 %126 }
  0xe6   :  { %v132_v17 = vmul.f32 %v127_v16, %v443_v10 }
  0xe8   :  { %v134_v18 = vsel %vm21_vm0, %v132_v17, 0.0 }
  0xe9   :  { %135 = vadd.xlane.f32.xlu1 %v134_v18 }
  0xed   :  { %v163_v19 = vpop.permute.xlu2 %162 }
  0xee   :  { %v168_v30 = vmul.f32 %v163_v19, %v443_v10 }
  0xf0   :  { %v170_v33 = vsel %vm21_vm0, %v168_v30, 0.0 }
  0xf5   :  { %v165_v20 = vpop.permute.xlu2 %164 }
  0xf6   :  { %v169_v37 = vmul.f32 %v165_v20, %v451_v13 }
  0xf8   :  { %v173_v40 = vsel %vm21_vm0, %v169_v37, 0.0 }
  0xfd   :  { %v199_v21 = vpop.permute.xlu2 %198  ;;  %v235_v41 = vpop.permute.xlu0 %234 }
  0xfe   :  { %v204_v22 = vmul.f32 %v199_v21, %v443_v10  ;;  %v91_v23 = vpop.permute.xlu1 %90  ;;  %v240_v42 = vmul.f32 %v235_v41, %v443_v10 }
  0xff   :  { %v96_v24 = vmul.f32 %v91_v23, %v443_v10 }
 0x100   :  { %v206_v25 = vsel %vm21_vm0, %v204_v22, 0.0  ;;  %v242_v43 = vsel %vm21_vm0, %v240_v42, 0.0 }
 0x101   :  { %207 = vadd.xlane.f32.xlu1 %v206_v25  ;;  %v98_v26 = vsel %vm21_vm0, %v96_v24, 0.0 }
 0x102   :  { %99 = vadd.xlane.f32.xlu2 %v98_v26 }
 0x105   :  { %v201_v35 = vpop.permute.xlu2 %200  ;;  %v271_v46 = vpop.permute.xlu0 %270 }
 0x106   :  { %v93_v27 = vpop.permute.xlu1 %92  ;;  %v205_v38 = vmul.f32 %v201_v35, %v451_v13  ;;  %v276_v48 = vmul.f32 %v271_v46, %v443_v10 }
 0x107   :  { %v97_v28 = vmul.f32 %v93_v27, %v451_v13 }
 0x108   :  { %v209_v39 = vsel %vm21_vm0, %v205_v38, 0.0  ;;  %v278_v50 = vsel %vm21_vm0, %v276_v48, 0.0 }
 0x109   :  { %v101_v29 = vsel %vm21_vm0, %v97_v28, 0.0 }
 0x10a   :  { %102 = vadd.xlane.f32.xlu2 %v101_v29 }
 0x10d   :  { %v237_v44 = vpop.permute.xlu2 %236  ;;  %v307_v49 = vpop.permute.xlu0 %306 }
 0x10e   :  { %v129_v31 = vpop.permute.xlu1 %128  ;;  %v241_v45 = vmul.f32 %v237_v44, %v451_v13  ;;  %v312_v21 = vmul.f32 %v307_v49, %v443_v10 }
 0x10f   :  { %v133_v32 = vmul.f32 %v129_v31, %v451_v13 }
 0x110   :  { %v245_v47 = vsel %vm21_vm0, %v241_v45, 0.0  ;;  %v314_v22 = vsel %vm21_vm0, %v312_v21, 0.0 }
 0x111   :  { %v137_v34 = vsel %vm21_vm0, %v133_v32, 0.0 }
 0x112   :  { %171 = vadd.xlane.f32.xlu2 %v170_v33  ;;  %138 = vadd.xlane.f32.xlu0 %v137_v34 }
 0x116   :  { %v273_v59 = vpop.permute.xlu1 %272 }
 0x117   :  { %v277_v15 = vmul.f32 %v273_v59, %v451_v13 }
 0x119   :  { %v281_v18 = vsel %vm21_vm0, %v277_v15, 0.0 }
 0x11a   :  { %210 = vadd.xlane.f32.xlu2 %v209_v39  ;;  %174 = vadd.xlane.f32.xlu0 %v173_v40 }
 0x11e   :  { %v309_v60 = vpop.permute.xlu1 %308 }
 0x11f   :  { %v313_v3 = vmul.f32 %v309_v60, %v451_v13 }
 0x121   :  { %v317_v7 = vsel %vm21_vm0, %v313_v3, 0.0 }
 0x122   :  { %243 = vadd.xlane.f32.xlu2 %v242_v43 }
 0x12a   :  { %246 = vadd.xlane.f32.xlu2 %v245_v47 }
 0x132   :  { %279 = vadd.xlane.f32.xlu2 %v278_v50 }
 0x138   :  { %v72_v52 = vpop.xlane.xlu0 %71 }
 0x139   :  { %v78_v53 = vmul.f32 %v408_v8, %v72_v52 }
 0x13b   :  { %v80_v54 = vadd.f32 %v78_v53, %v76_v51 }
 0x13d   :  { %82 = vst.msk [vmem:[#allocation3] sm:$0xff] %vm21_vm0, %v80_v54 }
 0x140   :  { %v75_v56 = vpop.xlane.xlu0 %74 }
 0x141   :  { %v79_v57 = vmul.f32 %v416_v9, %v75_v56 }
 0x143   :  { %v81_v58 = vadd.f32 %v79_v57, %v77_v55 }
 0x144   :  { %v104_v27 = vld [vmem:[#allocation3] sm:$0xff] }
 0x145   :  { %83 = vst.msk [vmem:[#allocation3 + $0x8] sm:$0xff] %vm21_vm0, %v81_v58 }
 0x14c   :  { %v105_v31 = vld [vmem:[#allocation3 + $0x8] sm:$0xff] }
 0x15c   :  { %v136_v61 = vpop.xlane.xlu1 %135 }
 0x15d   :  { %v142_v62 = vmul.f32 %v408_v8, %v136_v61 }
 0x15f   :  { %146 = vrot.lane.b32.xlu2 %v142_v62, %s362_s2 }
 0x174   :  { %v208_v14 = vpop.xlane.xlu1 %207 }
 0x175   :  { %v100_v63 = vpop.xlane.xlu2 %99  ;;  %v214_v17 = vmul.f32 %v408_v8, %v208_v14 }
 0x176   :  { %v106_v0 = vmul.f32 %v408_v8, %v100_v63 }
 0x178   :  { %110 = vrot.lane.b32.xlu0 %v106_v0, %s363_s23 }
 0x17d   :  { %v103_v1 = vpop.xlane.xlu2 %102 }
 0x17e   :  { %v107_v2 = vmul.f32 %v103_v1, %v416_v9 }
 0x180   :  { %112 = vrot.lane.b32.xlu1 %v107_v2, %s363_s23 }
 0x185   :  { %v172_v4 = vpop.xlane.xlu2 %171  ;;  %v139_v5 = vpop.xlane.xlu0 %138 }
 0x186   :  { %v143_v6 = vmul.f32 %v139_v5, %v416_v9  ;;  %v178_v13 = vmul.f32 %v408_v8, %v172_v4 }
 0x188   :  { %148 = vrot.lane.b32.xlu1 %v143_v6, %s362_s2  ;;  %318 = vadd.xlane.f32.xlu2 %v317_v7 }
 0x18d   :  { %v211_v11 = vpop.xlane.xlu2 %210  ;;  %v175_v25 = vpop.xlane.xlu0 %174 }
 0x18e   :  { %v215_v23 = vmul.f32 %v211_v11, %v416_v9  ;;  %v179_v26 = vmul.f32 %v175_v25, %v416_v9 }
 0x195   :  { %v244_v12 = vpop.xlane.xlu2 %243 }
 0x196   :  { %v250_v10 = vmul.f32 %v244_v12, %v408_v8 }
 0x19d   :  { %v247_v16 = vpop.xlane.xlu2 %246 }
 0x19e   :  { %v251_v24 = vmul.f32 %v247_v16, %v416_v9 }
 0x1a0   :  { %218 = vrot.lane.b32.xlu2 %v214_v17, %s367_s26 }
 0x1a2   :  { %282 = vadd.xlane.f32.xlu0 %v281_v18 }
 0x1a5   :  { %v280_v19 = vpop.xlane.xlu2 %279 }
 0x1a6   :  { %v286_v20 = vmul.f32 %v280_v19, %v408_v8 }
 0x1a8   :  { %290 = vrot.lane.b32.xlu2 %v286_v20, %s364_s3 }
 0x1b2   :  { %315 = vadd.xlane.f32.xlu1 %v314_v22 }
 0x1b6   :  { %182 = vrot.lane.b32.xlu0 %v178_v13, %s365_s24 }
 0x1b9   :  { %v147_v32 = vpop.permute.xlu2 %146 }
 0x1be   :  { %220 = vrot.lane.b32.xlu0 %v215_v23, %s367_s26 }
 0x1c6   :  { %256 = vrot.lane.b32.xlu0 %v251_v24, %s361_s0 }
 0x1cb   :  { %184 = vrot.lane.b32.xlu1 %v179_v26, %s365_s24 }
 0x1d3   :  { %254 = vrot.lane.b32.xlu1 %v250_v10, %s361_s0 }
 0x1ea   :  { %v111_v28 = vpop.permute.xlu0 %110 }
 0x1eb   :  { %v116_v29 = vadd.f32 %v111_v28, %v104_v27 }
 0x1ed   :  { %118 = vst.msk [vmem:[#allocation3] sm:$0xff] %vm21_vm0, %v116_v29 }
 0x1f2   :  { %v113_v30 = vpop.permute.xlu1 %112 }
 0x1f3   :  { %v117_v33 = vadd.f32 %v113_v30, %v105_v31 }
 0x1f4   :  { %v140_v34 = vld [vmem:[#allocation3] sm:$0xff] }
 0x1f5   :  { %119 = vst.msk [vmem:[#allocation3 + $0x8] sm:$0xff] %vm21_vm0, %v117_v33  ;;  %v152_v35 = vadd.f32 %v147_v32, %v140_v34 }
 0x1f7   :  { %154 = vst.msk [vmem:[#allocation3] sm:$0xff] %vm21_vm0, %v152_v35 }
 0x1fa   :  { %v149_v38 = vpop.permute.xlu1 %148 }
 0x1fb   :  { %v319_v36 = vpop.xlane.xlu2 %318 }
 0x1fc   :  { %v141_v37 = vld [vmem:[#allocation3 + $0x8] sm:$0xff]  ;;  %v323_v39 = vmul.f32 %v319_v36, %v416_v9 }
 0x1fd   :  { %v153_v40 = vadd.f32 %v149_v38, %v141_v37 }
 0x1fe   :  { %328 = vrot.lane.b32.xlu2 %v323_v39, %s366_s25  ;;  %v176_v45 = vld [vmem:[#allocation3] sm:$0xff] }
 0x1ff   :  { %155 = vst.msk [vmem:[#allocation3 + $0x8] sm:$0xff] %vm21_vm0, %v153_v40 }
 0x203   :  { %v219_v48 = vpop.permute.xlu2 %218 }
 0x206   :  { %v177_v51 = vld [vmem:[#allocation3 + $0x8] sm:$0xff] }
 0x20b   :  { %v291_v58 = vpop.permute.xlu2 %290 }
 0x215   :  { %v283_v41 = vpop.xlane.xlu0 %282 }
 0x216   :  { %v287_v42 = vmul.f32 %v283_v41, %v416_v9 }
 0x218   :  { %292 = vrot.lane.b32.xlu1 %v287_v42, %s364_s3 }
 0x225   :  { %v316_v43 = vpop.xlane.xlu1 %315 }
 0x226   :  { %v322_v44 = vmul.f32 %v316_v43, %v408_v8 }
 0x228   :  { %326 = vrot.lane.b32.xlu0 %v322_v44, %s366_s25  ;;  %v183_v46 = vpop.permute.xlu0 %182 }
 0x229   :  { %v188_v47 = vadd.f32 %v183_v46, %v176_v45 }
 0x22b   :  { %190 = vst.msk [vmem:[#allocation3] sm:$0xff] %vm21_vm0, %v188_v47 }
 0x230   :  { %v221_v55 = vpop.permute.xlu0 %220 }
 0x232   :  { %v212_v49 = vld [vmem:[#allocation3] sm:$0xff] }
 0x233   :  { %v224_v50 = vadd.f32 %v219_v48, %v212_v49 }
 0x235   :  { %226 = vst.msk [vmem:[#allocation3] sm:$0xff] %vm21_vm0, %v224_v50 }
 0x238   :  { %v257_v61 = vpop.permute.xlu0 %256 }
 0x23c   :  { %v248_v54 = vld [vmem:[#allocation3] sm:$0xff] }
 0x23d   :  { %v185_v52 = vpop.permute.xlu1 %184 }
 0x23e   :  { %v189_v9 = vadd.f32 %v185_v52, %v177_v51 }
 0x240   :  { %191 = vst.msk [vmem:[#allocation3 + $0x8] sm:$0xff] %vm21_vm0, %v189_v9 }
 0x245   :  { %v255_v53 = vpop.permute.xlu1 %254 }
 0x246   :  { %v260_v8 = vadd.f32 %v255_v53, %v248_v54 }
 0x247   :  { %v213_v56 = vld [vmem:[#allocation3 + $0x8] sm:$0xff] }
 0x248   :  { %v225_v57 = vadd.f32 %v221_v55, %v213_v56  ;;  %262 = vst.msk [vmem:[#allocation3] sm:$0xff] %vm21_vm0, %v260_v8 }
 0x24a   :  { %227 = vst.msk [vmem:[#allocation3 + $0x8] sm:$0xff] %vm21_vm0, %v225_v57 }
 0x24f   :  { %v284_v59 = vld [vmem:[#allocation3] sm:$0xff] }
 0x250   :  { %v296_v60 = vadd.f32 %v291_v58, %v284_v59 }
 0x251   :  { %v249_v62 = vld [vmem:[#allocation3 + $0x8] sm:$0xff] }
 0x252   :  { %v261_v63 = vadd.f32 %v257_v61, %v249_v62  ;;  %298 = vst.msk [vmem:[#allocation3] sm:$0xff] %vm21_vm0, %v296_v60 }
 0x254   :  { %263 = vst.msk [vmem:[#allocation3 + $0x8] sm:$0xff] %vm21_vm0, %v261_v63 }
 0x258   :  { %v329_v3 = vpop.permute.xlu2 %328 }
 0x259   :  { %v320_v6 = vld [vmem:[#allocation3] sm:$0xff] }
 0x25b   :  { %v285_v1 = vld [vmem:[#allocation3 + $0x8] sm:$0xff] }
 0x28a   :  { %v293_v0 = vpop.permute.xlu1 %292 }
 0x28b   :  { %v297_v2 = vadd.f32 %v293_v0, %v285_v1 }
 0x28d   :  { %299 = vst.msk [vmem:[#allocation3 + $0x8] sm:$0xff] %vm21_vm0, %v297_v2 }
 0x294   :  { %v321_v4 = vld [vmem:[#allocation3 + $0x8] sm:$0xff] }
 0x295   :  { %v333_v5 = vadd.f32 %v329_v3, %v321_v4 }
 0x297   :  { %335 = vst.msk [vmem:[#allocation3 + $0x8] sm:$0xff] %vm21_vm0, %v333_v5 }
 0x29a   :  { %v327_v7 = vpop.permute.xlu0 %326 }
 0x29b   :  { %v332_v11 = vadd.f32 %v327_v7, %v320_v6 }
 0x29d   :  { %334 = vst.msk [vmem:[#allocation3] sm:$0xff] %vm21_vm0, %v332_v11 }
 0x29e   :  { %v340_v12 = vld [vmem:[#allocation3 + $0x8] sm:$0xff] }
 0x29f   :  { %v342_v14 = vmul.f32 0.35355338, %v340_v12 }
 0x2a1   :  { %344 = vst.msk [vmem:[%s544_s4 + $0x8] sm:$0xff] %vm21_vm0, %v342_v14 }
 0x2a4   :  { %v339_v15 = vld [vmem:[#allocation3] sm:$0xff] }
 0x2a5   :  { %v341_v16 = vmul.f32 0.35355338, %v339_v15 }
 0x2a7   :  { %343 = vst.msk [vmem:[%s544_s4] sm:$0xff] %vm21_vm0, %v341_v16 }

</bundles_post_ra>
